<compile_context>
chip_gen: v7x
topology: tpu7x:2x2x1
jax: 0.10.0
libtpu: 0.0.40
codegen_flags: <defaults>
</compile_context>

<pallas_src>
import jax
import jax.numpy as jnp
from jax.experimental import pallas as pl
from jax.experimental.pallas import tpu as pltpu


def _round_up(x, m):
    return (x + m - 1) // m * m


def _vmem_capacity_bytes():
    """Physical VMEM per TensorCore; conservative fallback if the query fails."""
    try:
        return int(pltpu.get_tpu_info().vmem_capacity_bytes)
    except Exception:
        return 64 * 1024 * 1024  # v7x-sized fallback: safe on every generation


def _vmem_need_bytes(tm, th, E, itemsize):
    """Live VMEM for one grid step (E == H for this module)."""
    blocks = 2 * itemsize * (2 * tm * E + 3 * E * th)  # double-buffered x/out + 3 weight slices
    acc = 4 * tm * E                                   # f32 accumulator scratch
    staging = 12 * tm * th                             # f32 h1 / h2 / gate intermediates
    return blocks + acc + staging


def _choose_tiles(M, E, H, itemsize, row_align, budget):
    """Pick (tm, th) whose working set fits `budget`.

    Preference order: large token tiles first (arithmetic intensity of the streamed
    schedule is ~tm flop/byte), then large hidden slices (fewer f32 accumulator
    read-modify-write passes, better MXU occupancy).
    """
    tm_cap = min(_round_up(M, row_align), 1024)
    tms = sorted({min(tm_cap, _round_up(t, row_align))
                  for t in (1024, 768, 512, 384, 256, 128, 64, 32, 16, 8)},
                 reverse=True)
    # Hidden-slice candidates: multiples of 128 that evenly divide H (fallback: full H).
    ths = sorted({d for d in range(128, H + 1, 128) if H % d == 0} or {H},
                 reverse=True)

    for th_floor in (min(512, ths[0]), min(256, ths[0]), ths[-1]):
        for tm in tms:
            for th in ths:          # descending: first fit is the largest fitting th
                if th < th_floor:
                    break
                if _vmem_need_bytes(tm, th, E, itemsize) <= budget:
                    return tm, th
    return tms[-1], ths[-1]


def _ffn_kernel(x_ref, w1t_ref, w2t_ref, w3t_ref, o_ref, acc_ref):
    """One (token-tile i, hidden-slice h) grid step.  D := E == H.

    x_ref   : (TM, D)  token tile (block index constant over h -> fetched once per i)
    w1t_ref : (D, TH)  fc1.weight.T columns [h*TH:(h+1)*TH]
    w2t_ref : (D, TH)  fc2.weight.T columns [h*TH:(h+1)*TH]
    w3t_ref : (TH, D)  fc3.weight.T rows    [h*TH:(h+1)*TH]
    o_ref   : (TM, D)  output tile (revisited across h; written on the last h step)
    acc_ref : (TM, D)  f32 scratch accumulator across the hidden axis
    """
    h = pl.program_id(1)

    @pl.when(h == 0)
    def _():
        acc_ref[...] = jnp.zeros_like(acc_ref)

    x = x_ref[...]

    # Plain contractions over the shared dim -> MXU matmuls, f32 accumulation,
    # no in-kernel weight transposes.
    h1 = jnp.dot(x, w1t_ref[...], preferred_element_type=jnp.float32)
    h2 = jnp.dot(x, w2t_ref[...], preferred_element_type=jnp.float32)

    # SiLU gate in f32 (sigmoid runs on the EUP); single downcast before fc3.
    gated = h1 * jax.nn.sigmoid(h1) * h2

    # Partial fc3 contribution of this hidden slice, accumulated in f32.
    acc_ref[...] += jnp.dot(gated.astype(w3t_ref.dtype), w3t_ref[...],
                            preferred_element_type=jnp.float32)

    @pl.when(h == pl.num_programs(1) - 1)
    def _():
        o_ref[...] = acc_ref[...].astype(o_ref.dtype)


def feed_forward(x, w1, w2, w3, *, tile_m=None, tile_h=None, interpret=False):
    """Fused SwiGLU FFN matching the PyTorch module's forward.

    x : (B, S, E)
    w1: (H, E)  fc1.weight  (PyTorch (out_features, in_features) layout)
    w2: (E, H)  fc2.weight
    w3: (E, H)  fc3.weight
    returns (B, S, E)
    """
    B, S, E = x.shape
    H, E1 = w1.shape
    assert E1 == E and w2.shape == (E, H) and w3.shape == (E, H)
    # The original forward applies fc2 / the gate directly to x, so it only works
    # when emb_dim == hidden_dim.  Keep that requirement (faithful semantics).
    assert E == H, "FeedForward.forward as written requires emb_dim == hidden_dim"

    M = B * S
    itemsize = jnp.dtype(x.dtype).itemsize
    row_align = 16 if itemsize == 2 else 8          # bf16 packs 2 rows per sublane

    capacity = _vmem_capacity_bytes()
    budget = capacity * 3 // 4                      # ~96 MiB v5e/v6e, ~48 MiB v7x

    tm, th = _choose_tiles(M, E, H, itemsize, row_align, budget)
    if tile_m is not None:
        tm = _round_up(min(tile_m, _round_up(M, row_align)), row_align)
    if tile_h is not None and H % tile_h == 0 and (tile_h == H or tile_h % 128 == 0):
        th = tile_h

    # Resident-weights mode (th == H): weight block indices are constant over the whole
    # grid, so the weights are DMA'd from HBM exactly once.  Splitting the token axis
    # then adds no HBM traffic, so guarantee >= 2 blocks on the "parallel" axis for
    # megacore (v7x) utilization.
    if H // th == 1:
        while pl.cdiv(M, tm) < 2 and tm >= 2 * row_align:
            tm = _round_up(tm // 2, row_align)
    # TODO(synk): for the small-M decode regime on v7x, split the hidden reduction
    # across the two TensorCores (each streams half the weights) instead.

    n_tok = pl.cdiv(M, tm)
    grid = (n_tok, H // th)

    # Pre-transpose once (outside the kernel) so every matmul is a plain (M,K)x(K,N)
    # contraction; in a real model these would be stored pre-transposed at load time.
    w1t = w1.T      # (E, H)
    w2t = w2.T      # (H, E)
    w3t = w3.T      # (H, E)

    # No padding of x: Pallas masks the final partial token tile; rows are independent,
    # so any garbage in the padded region only affects dropped output rows.
    x2d = x.reshape(M, E)

    vmem_need = _vmem_need_bytes(tm, th, E, itemsize)
    vmem_limit = int(min(max(vmem_need * 5 // 4, 32 * 1024 * 1024),
                         capacity * 7 // 8))        # never below vmem_need for auto tiles

    # Advisory cost estimate reflecting the real streamed weight traffic.
    weight_passes = 1 if H // th == 1 else n_tok
    cost = pl.CostEstimate(
        flops=6 * M * E * H,                        # three MxExH-sized matmuls
        transcendentals=M * H,                      # one sigmoid per gate element
        bytes_accessed=2 * M * E * itemsize + weight_passes * 3 * E * H * itemsize,
    )

    out2d = pl.pallas_call(
        _ffn_kernel,
        out_shape=jax.ShapeDtypeStruct((M, E), x.dtype),
        grid_spec=pltpu.PrefetchScalarGridSpec(
            num_scalar_prefetch=0,
            grid=grid,
            in_specs=[
                pl.BlockSpec((tm, E), lambda i, h: (i, 0)),   # x token tile
                pl.BlockSpec((E, th), lambda i, h: (0, h)),   # fc1.weight.T columns
                pl.BlockSpec((H, th), lambda i, h: (0, h)),   # fc2.weight.T columns
                pl.BlockSpec((th, E), lambda i, h: (h, 0)),   # fc3.weight.T rows
            ],
            out_specs=pl.BlockSpec((tm, E), lambda i, h: (i, 0)),
            scratch_shapes=[pltpu.VMEM((tm, E), jnp.float32)],
        ),
        compiler_params=pltpu.CompilerParams(
            dimension_semantics=("parallel", "arbitrary"),
            vmem_limit_bytes=vmem_limit,
        ),
        cost_estimate=cost,
        interpret=interpret,
    )(x2d, w1t, w2t, w3t)

    return out2d.reshape(B, S, E)


def feed_forward_ref(x, w1, w2, w3):
    """Pure-JAX f32 reference matching the PyTorch forward exactly."""
    xf = x.astype(jnp.float32)
    w1f, w2f, w3f = (w.astype(jnp.float32) for w in (w1, w2, w3))
    h1 = xf @ w1f.T
    h2 = xf @ w2f.T
    g = jax.nn.silu(h1) * h2
    return g @ w3f.T


if __name__ == "__main__":
    # Small config consistent with the module (emb_dim == hidden_dim required by the
    # forward pass as written).  bf16 exercises the fast MXU path.
    cfg = {"emb_dim": 128, "hidden_dim": 128, "dtype": jnp.bfloat16}
    B, S = 2, 8
    E, H = cfg["emb_dim"], cfg["hidden_dim"]
    dt = cfg["dtype"]

    key = jax.random.PRNGKey(0)
    kx, k1, k2, k3 = jax.random.split(key, 4)

    x = jax.random.normal(kx, (B, S, E), dtype=dt)
    # nn.Linear weight shapes: (out_features, in_features), exactly as PyTorch stores them.
    w1 = (jax.random.normal(k1, (H, E), dtype=dt) * 0.02).astype(dt)  # fc1.weight
    w2 = (jax.random.normal(k2, (E, H), dtype=dt) * 0.02).astype(dt)  # fc2.weight
    w3 = (jax.random.normal(k3, (E, H), dtype=dt) * 0.02).astype(dt)  # fc3.weight

    out = feed_forward(x, w1, w2, w3)
    out = jax.block_until_ready(out)
    assert out.shape == (B, S, E)
    assert out.dtype == dt

    ref = feed_forward_ref(x, w1, w2, w3)
    err = float(jnp.max(jnp.abs(out.astype(jnp.float32) - ref)))
    assert err < 2e-3, f"mismatch vs reference: max abs err {err}"

    print("KERNEL_OK")
</pallas_src>

<mosaic_0001>
module attributes {stable_mosaic.version = 11 : i64} {
  func.func @_ffn_kernel(%arg0: i32, %arg1: i32, %arg2: memref<16x128xbf16, #tpu.memory_space<vmem>>, %arg3: memref<128x128xbf16, #tpu.memory_space<vmem>>, %arg4: memref<128x128xbf16, #tpu.memory_space<vmem>>, %arg5: memref<128x128xbf16, #tpu.memory_space<vmem>>, %arg6: memref<16x128xbf16, #tpu.memory_space<vmem>>, %arg7: memref<16x128xf32, #tpu.memory_space<vmem>>) attributes {dimension_semantics = [#tpu.dimension_semantics<parallel>, #tpu.dimension_semantics<arbitrary>], iteration_bounds = array<i64: 1, 1>, scalar_prefetch = 0 : i64, scratch_operands = 1 : i64, tpu.core_type = #tpu.core_type<tc>, window_params = [{transform_indices = @transform_0, window_bounds = array<i64: 16, 128>}, {transform_indices = @transform_1, window_bounds = array<i64: 128, 128>}, {transform_indices = @transform_2, window_bounds = array<i64: 128, 128>}, {transform_indices = @transform_3, window_bounds = array<i64: 128, 128>}, {transform_indices = @transform_4, window_bounds = array<i64: 16, 128>}]} {
    %c0_i32 = arith.constant 0 : i32
    %0 = arith.cmpi eq, %arg1, %c0_i32 : i32
    %1 = arith.extui %0 : i1 to i32
    %c0_i32_0 = arith.constant 0 : i32
    %2 = arith.cmpi ne, %1, %c0_i32_0 : i32
    scf.if %2 {
      %cst_17 = arith.constant 0.000000e+00 : f32
      %24 = vector.broadcast %cst_17 : f32 to vector<16x128xf32>
      %c0_18 = arith.constant 0 : index
      %c0_19 = arith.constant 0 : index
      %25 = vector.load %arg7[%c0_18, %c0_19] : memref<16x128xf32, #tpu.memory_space<vmem>>, vector<16x128xf32>
      tpu.vector_store %arg7[%c0_18, %c0_19], %24 {strides = array<i32>} : memref<16x128xf32, #tpu.memory_space<vmem>>, vector<16x128xf32>,
    } else {
    }
    %c0 = arith.constant 0 : index
    %c0_1 = arith.constant 0 : index
    %3 = vector.load %arg2[%c0, %c0_1] : memref<16x128xbf16, #tpu.memory_space<vmem>>, vector<16x128xbf16>
    %c0_2 = arith.constant 0 : index
    %c0_3 = arith.constant 0 : index
    %4 = vector.load %arg3[%c0_2, %c0_3] : memref<128x128xbf16, #tpu.memory_space<vmem>>, vector<128x128xbf16>
    %cst = arith.constant dense<0.000000e+00> : vector<16x128xf32>
    %5 = tpu.matmul %3, %4, %cst {dimension_numbers = #tpu.dot_dimension_numbers<[1], [0], [0], [1], [0, 0, 1, 1], [], []>} : vector<16x128xbf16>, vector<128x128xbf16>, vector<16x128xf32> -> vector<16x128xf32>
    %c0_4 = arith.constant 0 : index
    %c0_5 = arith.constant 0 : index
    %6 = vector.load %arg4[%c0_4, %c0_5] : memref<128x128xbf16, #tpu.memory_space<vmem>>, vector<128x128xbf16>
    %cst_6 = arith.constant dense<0.000000e+00> : vector<16x128xf32>
    %7 = tpu.matmul %3, %6, %cst_6 {dimension_numbers = #tpu.dot_dimension_numbers<[1], [0], [0], [1], [0, 0, 1, 1], [], []>} : vector<16x128xbf16>, vector<128x128xbf16>, vector<16x128xf32> -> vector<16x128xf32>
    %8 = arith.negf %5 : vector<16x128xf32>
    %9 = math.exp %8 : vector<16x128xf32>
    %cst_7 = arith.constant 1.000000e+00 : f32
    %10 = vector.broadcast %cst_7 : f32 to vector<16x128xf32>
    %11 = arith.addf %10, %9 : vector<16x128xf32>
    %12 = arith.divf %10, %11 : vector<16x128xf32>
    %13 = arith.mulf %5, %12 : vector<16x128xf32>
    %14 = arith.mulf %13, %7 : vector<16x128xf32>
    %c0_8 = arith.constant 0 : index
    %c0_9 = arith.constant 0 : index
    %15 = vector.load %arg7[%c0_8, %c0_9] : memref<16x128xf32, #tpu.memory_space<vmem>>, vector<16x128xf32>
    %16 = arith.truncf %14 : vector<16x128xf32> to vector<16x128xbf16>
    %c0_10 = arith.constant 0 : index
    %c0_11 = arith.constant 0 : index
    %17 = vector.load %arg5[%c0_10, %c0_11] : memref<128x128xbf16, #tpu.memory_space<vmem>>, vector<128x128xbf16>
    %cst_12 = arith.constant dense<0.000000e+00> : vector<16x128xf32>
    %18 = tpu.matmul %16, %17, %cst_12 {dimension_numbers = #tpu.dot_dimension_numbers<[1], [0], [0], [1], [0, 0, 1, 1], [], []>} : vector<16x128xbf16>, vector<128x128xbf16>, vector<16x128xf32> -> vector<16x128xf32>
    %19 = arith.addf %15, %18 : vector<16x128xf32>
    %c0_13 = arith.constant 0 : index
    %c0_14 = arith.constant 0 : index
    %20 = vector.load %arg7[%c0_13, %c0_14] : memref<16x128xf32, #tpu.memory_space<vmem>>, vector<16x128xf32>
    tpu.vector_store %arg7[%c0_13, %c0_14], %19 {strides = array<i32>} : memref<16x128xf32, #tpu.memory_space<vmem>>, vector<16x128xf32>,
    %c0_i32_15 = arith.constant 0 : i32
    %21 = arith.cmpi eq, %arg1, %c0_i32_15 : i32
    %22 = arith.extui %21 : i1 to i32
    %c0_i32_16 = arith.constant 0 : i32
    %23 = arith.cmpi ne, %22, %c0_i32_16 : i32
    scf.if %23 {
      %c0_17 = arith.constant 0 : index
      %c0_18 = arith.constant 0 : index
      %24 = vector.load %arg7[%c0_17, %c0_18] : memref<16x128xf32, #tpu.memory_space<vmem>>, vector<16x128xf32>
      %25 = arith.truncf %24 : vector<16x128xf32> to vector<16x128xbf16>
      %c0_19 = arith.constant 0 : index
      %c0_20 = arith.constant 0 : index
      %26 = vector.load %arg6[%c0_19, %c0_20] : memref<16x128xbf16, #tpu.memory_space<vmem>>, vector<16x128xbf16>
      tpu.vector_store %arg6[%c0_19, %c0_20], %25 {strides = array<i32>} : memref<16x128xbf16, #tpu.memory_space<vmem>>, vector<16x128xbf16>,
    } else {
    }
    return
  }
  func.func @transform_0(%arg0: i32, %arg1: i32) -> (i32, i32) {
    %c0_i32 = arith.constant 0 : i32
    %c0_i32_0 = arith.constant 0 : i32
    return %arg0, %c0_i32 : i32, i32
  }
  func.func @transform_1(%arg0: i32, %arg1: i32) -> (i32, i32) {
    %c0_i32 = arith.constant 0 : i32
    %c0_i32_0 = arith.constant 0 : i32
    return %c0_i32, %arg1 : i32, i32
  }
  func.func @transform_2(%arg0: i32, %arg1: i32) -> (i32, i32) {
    %c0_i32 = arith.constant 0 : i32
    %c0_i32_0 = arith.constant 0 : i32
    return %c0_i32, %arg1 : i32, i32
  }
  func.func @transform_3(%arg0: i32, %arg1: i32) -> (i32, i32) {
    %c0_i32 = arith.constant 0 : i32
    %c0_i32_0 = arith.constant 0 : i32
    return %arg1, %c0_i32 : i32, i32
  }
  func.func @transform_4(%arg0: i32, %arg1: i32) -> (i32, i32) {
    %c0_i32 = arith.constant 0 : i32
    %c0_i32_0 = arith.constant 0 : i32
    return %arg0, %c0_i32 : i32, i32
  }
}

</mosaic_0001>

<bundles_post_ra>
// kernel: tpu_custom_call.1
= control target key start
LH: loop header
LB: loop body
LE: loop exit
PB: predicated region body
PF: predicated region fallthrough
CT: control target
= control target key end

     0   :  { %9 = vsyncpa [#allocation4], 0  ;;  %s896_s0 = inlined_call_operand.hbm [shape: bf16[16,128], index: 0, kind: input, shape index: {}]   ;;  %s897_s1 = inlined_call_operand.hbm [shape: bf16[128,128], index: 1, kind: input, shape index: {}]   ;;  %s898_s2 = inlined_call_operand.hbm [shape: bf16[128,128], index: 2, kind: input, shape index: {}]   ;;  %s899_s3 = inlined_call_operand.hbm [shape: bf16[128,128], index: 3, kind: input, shape index: {}]   ;;  %s900_s4 = inlined_call_operand.hbm [shape: bf16[16,128], index: 4, kind: output, shape index: {}]  }
   0x1   :  { %10 = vsyncpa [#allocation7], 0 }
   0x2   :  { %11 = vsyncpa [#allocation10], 0 }
   0x3   :  { %12 = vsyncpa [#allocation5], 0  ;;  %s743_s15 = smov [#allocation6]   ;;  %s744_s17 = smov [#allocation3]  }
   0x4   :  { %s30_s16 = sshll.u32 %s743_s15, 4  ;;  %s18_s18 = sshll.u32 %s744_s17, 4  ;;  %s31_s16 = int_to_ptr.vmem [resolvable:$true] %s30_s16  ;;  %s777_s18 = int_to_ptr.vmem [resolvable:$true] %s18_s18 }
   0x5   :  { %s625_s21 = scalar_lea.hbm %s897_s1, 1024 }
   0x6   :  { %p626_p0 = scmp.ne.s32.totalorder %s897_s1, %s625_s21  ;;  %p629_p1 = scmp.lt.u32.totalorder %s625_s21, %s897_s1 }
   0x8   :  { %p631_p2 = pnand %p629_p1, %p626_p0 }
   0xa   :  { %634 = shalt.err (!%p631_p2)
}
   0xb   :  { %s635_s26 = scalar_lea.vmem %s31_s16, 1024  ;;  %p640_p4 = scmp.lt.s32.totalorder %s31_s16, %s31_s16 }
   0xc   :  { %p636_p3 = scmp.ne.s32.totalorder %s31_s16, %s635_s26  ;;  %p641_p5 = scmp.lt.s32.totalorder %s635_s26, %s635_s26 }
   0xe   :  { %p642_p6 = por %p641_p5, %p640_p4 }
  0x10   :  { %p643_p7 = pnand %p642_p6, %p636_p3 }
  0x12   :  { %646 = shalt.err (!%p643_p7)
}
  0x13   :  { %s745_s27 = smov 64   ;;  %s746_s28 = smov 4  }
  0x14   :  { %36 = dma.hbm_to_vmem [thread:$0]  %s897_s1, 1024, %s31_s16, [#allocation7], %s745_s27, %s745_s27, %s746_s28  }
  0x15   :  { %s647_s7 = scalar_lea.hbm %s896_s0, 128 }
  0x16   :  { %p648_p8 = scmp.ne.s32.totalorder %s896_s0, %s647_s7  ;;  %p651_p9 = scmp.lt.u32.totalorder %s647_s7, %s896_s0 }
  0x18   :  { %p653_p10 = pnand %p651_p9, %p648_p8 }
  0x1a   :  { %656 = shalt.err (!%p653_p10)
}
  0x1b   :  { %s657_s12 = scalar_lea.vmem %s777_s18, 128  ;;  %p662_p12 = scmp.lt.s32.totalorder %s777_s18, %s777_s18 }
  0x1c   :  { %p658_p11 = scmp.ne.s32.totalorder %s777_s18, %s657_s12  ;;  %p663_p13 = scmp.lt.s32.totalorder %s657_s12, %s657_s12 }
  0x1e   :  { %p664_p0 = por %p663_p13, %p662_p12 }
  0x20   :  { %p665_p1 = pnand %p664_p0, %p658_p11 }
  0x22   :  { %668 = shalt.err (!%p665_p1)
}
  0x23   :  { %24 = dma.hbm_to_vmem [thread:$0]  %s896_s0, 128, %s777_s18, [#allocation4], %s745_s27, %s745_s27, %s746_s28  }
  0x24   :  { %s747_s14 = smov [#allocation8]   ;;  %s748_s16 = smov [#allocation9]  }
  0x25   :  { %s42_s15 = sshll.u32 %s747_s14, 4  ;;  %s54_s17 = sshll.u32 %s748_s16, 4  ;;  %s43_s15 = int_to_ptr.vmem [resolvable:$true] %s42_s15  ;;  %s814_s17 = int_to_ptr.vmem [resolvable:$true] %s54_s17 }
  0x26   :  { %s669_s21 = scalar_lea.hbm %s898_s2, 1024 }
  0x27   :  { %p670_p2 = scmp.ne.s32.totalorder %s898_s2, %s669_s21  ;;  %p673_p3 = scmp.lt.u32.totalorder %s669_s21, %s898_s2 }
  0x29   :  { %p675_p4 = pnand %p673_p3, %p670_p2 }
  0x2b   :  { %678 = shalt.err (!%p675_p4)
}
  0x2c   :  { %s679_s0 = scalar_lea.vmem %s43_s15, 1024  ;;  %p684_p6 = scmp.lt.s32.totalorder %s43_s15, %s43_s15 }
  0x2d   :  { %p680_p5 = scmp.ne.s32.totalorder %s43_s15, %s679_s0  ;;  %p685_p7 = scmp.lt.s32.totalorder %s679_s0, %s679_s0 }
  0x2f   :  { %p686_p8 = por %p685_p7, %p684_p6 }
  0x31   :  { %p687_p9 = pnand %p686_p8, %p680_p5 }
  0x33   :  { %690 = shalt.err (!%p687_p9)
}
  0x34   :  { %48 = dma.hbm_to_vmem [thread:$0]  %s898_s2, 1024, %s43_s15, [#allocation7], %s745_s27, %s745_s27, %s746_s28  }
  0x35   :  { %s691_s5 = scalar_lea.hbm %s899_s3, 1024 }
  0x36   :  { %p692_p10 = scmp.ne.s32.totalorder %s899_s3, %s691_s5  ;;  %p695_p11 = scmp.lt.u32.totalorder %s691_s5, %s899_s3 }
  0x38   :  { %p697_p12 = pnand %p695_p11, %p692_p10 }
  0x3a   :  { %700 = shalt.err (!%p697_p12)
}
  0x3b   :  { %s701_s10 = scalar_lea.vmem %s814_s17, 1024  ;;  %p706_p0 = scmp.lt.s32.totalorder %s814_s17, %s814_s17 }
  0x3c   :  { %p702_p13 = scmp.ne.s32.totalorder %s814_s17, %s701_s10  ;;  %p707_p1 = scmp.lt.s32.totalorder %s701_s10, %s701_s10 }
  0x3e   :  { %p708_p2 = por %p707_p1, %p706_p0 }
  0x40   :  { %p709_p3 = pnand %p708_p2, %p702_p13 }
  0x42   :  { %712 = shalt.err (!%p709_p3)
}
  0x43   :  { %60 = dma.hbm_to_vmem [thread:$0]  %s899_s3, 1024, %s814_s17, [#allocation10], %s745_s27, %s745_s27, %s746_s28  }
  0x44   :  { %735 = dma.done.wait [#allocation4], 128  }
  0x45   :  { %736 = vsyncadd [#allocation4], 4294967168 }
  0x46   :  { %737 = dma.done.wait [#allocation7], 2048  }
  0x47   :  { %738 = vsyncadd [#allocation7], 4294965248 }
  0x48   :  { %739 = dma.done.wait [#allocation10], 1024  }
  0x49   :  { %740 = vsyncadd [#allocation10], 4294966272  ;;  %v749_v0 = vmov 0.0   ;;  %vm750_vm0 = vmmov 0   ;;  %v592_v1 = vld [vmem:[#allocation6] sm:$0xff]   ;;  %v593_v2 = vld [vmem:[#allocation6 + $0x8] sm:$0xff]  }
  0x4a   :  { %523 = vmatprep.subr.bf16.mxu0 %v749_v0  ;;  %543 = vmatprep.subr.bf16.mxu1 %v749_v0  ;;  %v594_v3 = vld [vmem:[#allocation6 + $0x10] sm:$0xff]   ;;  %v599_v4 = vld [vmem:[#allocation8] sm:$0xff]   ;;  %v601_v5 = vld [vmem:[#allocation8 + $0x8] sm:$0xff]   ;;  %s751_s3 = smov [#allocation11]  }
  0x4b   :  { %539 = vmatprep.mubr.msk.bf16.mxu0 %vm750_vm0, %v749_v0  ;;  %559 = vmatprep.mubr.msk.bf16.mxu1 %vm750_vm0, %v749_v0  ;;  %v595_v6 = vld [vmem:[#allocation6 + $0x18] sm:$0xff]   ;;  %v603_v7 = vld [vmem:[#allocation8 + $0x10] sm:$0xff]   ;;  %v596_v8 = vld [vmem:[#allocation6 + $0x20] sm:$0xff]   ;;  %s446_s12 = sshll.u32 %s751_s3, 4  ;;  %s447_s12 = int_to_ptr.vmem [resolvable:$true] %s446_s12 }
  0x4c   :  { %524 = vmatpush3.bf16.msra.mxu0 %v592_v1  ;;  %544 = vmatpush3.bf16.msra.mxu1 %v599_v4  ;;  %v597_v9 = vld [vmem:[#allocation6 + $0x28] sm:$0xff]   ;;  %v604_v10 = vld [vmem:[#allocation8 + $0x18] sm:$0xff]   ;;  %v605_v11 = vld [vmem:[#allocation8 + $0x20] sm:$0xff]   ;;  %s713_s1 = scalar_lea.vmem %s447_s12, 128  ;;  %p718_p5 = scmp.lt.s32.totalorder %s447_s12, %s447_s12 }
  0x4d   :  { %525 = vmatprep.subr.bf16.mxu0 %v749_v0  ;;  %545 = vmatprep.subr.bf16.mxu1 %v749_v0  ;;  %v598_v12 = vld [vmem:[#allocation6 + $0x30] sm:$0xff]   ;;  %v606_v13 = vld [vmem:[#allocation8 + $0x28] sm:$0xff]   ;;  %v600_v14 = vld [vmem:[#allocation6 + $0x38] sm:$0xff]   ;;  %p714_p4 = scmp.ne.s32.totalorder %s447_s12, %s713_s1  ;;  %p719_p6 = scmp.lt.s32.totalorder %s713_s1, %s713_s1 }
  0x4e   :  { %v602_v15 = vld [vmem:[#allocation3] sm:$0xff]   ;;  %v607_v16 = vld [vmem:[#allocation8 + $0x30] sm:$0xff]   ;;  %v609_v18 = vld [vmem:[#allocation9] sm:$0xff]  }
  0x4f   :  { %v608_v17 = vld [vmem:[#allocation8 + $0x38] sm:$0xff]   ;;  %v610_v19 = vld [vmem:[#allocation9 + $0x8] sm:$0xff]   ;;  %v611_v20 = vld [vmem:[#allocation9 + $0x10] sm:$0xff]   ;;  %p720_p7 = por %p719_p6, %p718_p5 }
  0x50   :  { %526 = vmatpush3.bf16.msra.mxu0 %v593_v2  ;;  %546 = vmatpush3.bf16.msra.mxu1 %v601_v5  ;;  %v612_v21 = vld [vmem:[#allocation9 + $0x18] sm:$0xff]   ;;  %v613_v22 = vld [vmem:[#allocation9 + $0x20] sm:$0xff]   ;;  %v614_v23 = vld [vmem:[#allocation9 + $0x28] sm:$0xff]  }
  0x51   :  { %527 = vmatprep.subr.bf16.mxu0 %v749_v0  ;;  %547 = vmatprep.subr.bf16.mxu1 %v749_v0  ;;  %v615_v24 = vld [vmem:[#allocation9 + $0x30] sm:$0xff]   ;;  %v616_v25 = vld [vmem:[#allocation9 + $0x38] sm:$0xff]   ;;  %p721_p8 = pnand %p720_p7, %p714_p4 }
  0x54   :  { %528 = vmatpush3.bf16.msra.mxu0 %v594_v3  ;;  %548 = vmatpush3.bf16.msra.mxu1 %v603_v7 }
  0x55   :  { %529 = vmatprep.subr.bf16.mxu0 %v749_v0  ;;  %549 = vmatprep.subr.bf16.mxu1 %v749_v0 }
  0x58   :  { %530 = vmatpush3.bf16.msra.mxu0 %v595_v6  ;;  %550 = vmatpush3.bf16.msra.mxu1 %v604_v10 }
  0x59   :  { %531 = vmatprep.subr.bf16.mxu0 %v749_v0  ;;  %551 = vmatprep.subr.bf16.mxu1 %v749_v0 }
  0x5c   :  { %532 = vmatpush3.bf16.msra.mxu0 %v596_v8  ;;  %552 = vmatpush3.bf16.msra.mxu1 %v605_v11 }
  0x5d   :  { %533 = vmatprep.subr.bf16.mxu0 %v749_v0  ;;  %553 = vmatprep.subr.bf16.mxu1 %v749_v0 }
  0x60   :  { %534 = vmatpush3.bf16.msra.mxu0 %v597_v9  ;;  %554 = vmatpush3.bf16.msra.mxu1 %v606_v13 }
  0x61   :  { %535 = vmatprep.subr.bf16.mxu0 %v749_v0  ;;  %555 = vmatprep.subr.bf16.mxu1 %v749_v0 }
  0x64   :  { %536 = vmatpush3.bf16.msra.mxu0 %v598_v12  ;;  %556 = vmatpush3.bf16.msra.mxu1 %v607_v16 }
  0x65   :  { %537 = vmatprep.subr.bf16.mxu0 %v749_v0  ;;  %557 = vmatprep.subr.bf16.mxu1 %v749_v0 }
  0x68   :  { %538 = vmatpush3.bf16.msra.mxu0 %v600_v14  ;;  %558 = vmatpush3.bf16.msra.mxu1 %v608_v17 }
  0x69   :  { %563 = vmatprep.subr.bf16.mxu0 %v749_v0 }
  0x6b   :  { %540 = vmatmul.mubr.bf16.vlgmr.msra.gmra.mrb[0].mxu0 %v602_v15  ;;  %560 = vmatmul.mubr.bf16.vlgmr.msra.gmra.mrb[0].mxu1 %v602_v15 }
  0x6c   :  { %579 = vmatprep.mubr.msk.bf16.mxu0 %vm750_vm0, %v749_v0  ;;  %564 = vmatpush3.bf16.msra.mxu0 %v609_v18 }
  0x6d   :  { %565 = vmatprep.subr.bf16.mxu0 %v749_v0 }
  0x70   :  { %566 = vmatpush3.bf16.msra.mxu0 %v610_v19 }
  0x71   :  { %567 = vmatprep.subr.bf16.mxu0 %v749_v0 }
  0x74   :  { %568 = vmatpush3.bf16.msra.mxu0 %v611_v20 }
  0x75   :  { %569 = vmatprep.subr.bf16.mxu0 %v749_v0 }
  0x78   :  { %570 = vmatpush3.bf16.msra.mxu0 %v612_v21 }
  0x79   :  { %571 = vmatprep.subr.bf16.mxu0 %v749_v0 }
  0x7c   :  { %572 = vmatpush3.bf16.msra.mxu0 %v613_v22 }
  0x7d   :  { %573 = vmatprep.subr.bf16.mxu0 %v749_v0 }
  0x80   :  { %574 = vmatpush3.bf16.msra.mxu0 %v614_v23 }
  0x81   :  { %575 = vmatprep.subr.bf16.mxu0 %v749_v0 }
  0x84   :  { %576 = vmatpush3.bf16.msra.mxu0 %v615_v24 }
  0x85   :  { %577 = vmatprep.subr.bf16.mxu0 %v749_v0 }
  0x88   :  { %578 = vmatpush3.bf16.msra.mxu0 %v616_v25 }
 0x13e   :  { %v186_v26 = vpop.f32.mrb[0].mxu0  ;;  %v291_v32 = vpop.f32.mrb[0].mxu1 }
 0x13f   :  { %v477_v27 = vmul.f32 -1.442695, %v186_v26  ;;  %v541_v28 = vpop.f32.mrb[1].mxu0  ;;  %v561_v33 = vpop.f32.mrb[1].mxu1 }
 0x140   :  { %v189_v29 = vpop.f32.mrb[2].mxu0  ;;  %v294_v34 = vpop.f32.mrb[2].mxu1 }
 0x141   :  { %617 = vpow2.f32 %v477_v27  ;;  %v478_v30 = vmul.f32 -1.442695, %v189_v29  ;;  %v542_v31 = vpop.f32.mrb[3].mxu0  ;;  %v562_v35 = vpop.f32.mrb[3].mxu1 }
 0x143   :  { %619 = vpow2.f32 %v478_v30 }
 0x14b   :  { %v618_v36 = vpop.eup %617 }
 0x14c   :  { %v304_v37 = vadd.f32 1.0, %v618_v36 }
 0x14d   :  { %v620_v38 = vpop.eup %619 }
 0x14e   :  { %621 = vrcp.f32 %v304_v37  ;;  %v305_v39 = vadd.f32 1.0, %v620_v38 }
 0x150   :  { %623 = vrcp.f32 %v305_v39 }
 0x158   :  { %v622_v40 = vpop.eup %621 }
 0x159   :  { %v310_v41 = vmul.f32 %v622_v40, %v186_v26 }
 0x15a   :  { %v624_v42 = vpop.eup %623 }
 0x15b   :  { %v311_v43 = vmul.f32 %v624_v42, %v189_v29  ;;  %v312_v44 = vmul.f32 %v310_v41, %v291_v32 }
 0x15d   :  { %v313_v45 = vmul.f32 %v311_v43, %v294_v34 }
 0x15f   :  { %v316_v46 = vpack.c.bf16 %v313_v45, %v312_v44 }
 0x161   :  { %580 = vmatmul.mubr.bf16.vlgmr.msra.gmra.mrb[4].mxu0 %v316_v46 }
 0x234   :  { %v415_v47 = vpop.f32.mrb[4].mxu0 }
 0x235   :  { %v581_v48 = vpop.f32.mrb[5].mxu0 }
 0x236   :  { %v418_v49 = vpop.f32.mrb[6].mxu0 }
 0x237   :  { %v494_v50 = vpack.c.bf16 %v418_v49, %v415_v47  ;;  %v582_v51 = vpop.f32.mrb[7].mxu0 }
 0x239   :  { %495 = vst [vmem:[#allocation11] sm:$0xff] %v494_v50  }
 0x23a   :  { %724 = shalt.err (!%p721_p8)
}
 0x23b   :  { %s725_s15 = scalar_lea.hbm %s900_s4, 128 }
 0x23c   :  { %p726_p9 = scmp.ne.s32.totalorder %s900_s4, %s725_s15  ;;  %p729_p10 = scmp.lt.u32.totalorder %s725_s15, %s900_s4 }
 0x23e   :  { %p731_p11 = pnand %p729_p10, %p726_p9 }
 0x240   :  { %734 = shalt.err (!%p731_p11)
}
 0x241   :  { %452 = dma.vmem_to_hbm [thread:$0]  %s447_s12, 128, %s900_s4, [#allocation5], %s745_s27, %s745_s27, %s746_s28  }
 0x242   :  { %741 = dma.done.wait [#allocation5], 128  }
 0x243   :  { %742 = vsyncadd [#allocation5], 4294967168 }
 0x244   :  { %456 = vsyncpa [#allocation4], 1 }
 0x245   :  { %457 = vsyncpa [#allocation7], 1 }
 0x246   :  { %458 = vsyncpa [#allocation10], 1 }
 0x247   :  { %459 = vsyncpa [#allocation5], 1 }

</bundles_post_ra>
